<compile_context>
chip_gen: v7x
topology: tpu7x:2x2x1
jax: 0.10.0
libtpu: 0.0.40
codegen_flags: <defaults>
</compile_context>

<pallas_src>
import functools

import jax
import jax.numpy as jnp
from jax.experimental import pallas as pl
from jax.experimental.pallas import tpu as pltpu

_LANE = 1024        # lane-dense last dim (multiple of 128) -> unmasked stores
_BLOCK_ROWS = 512   # sublane tile (multiple of 8); 512*1024*4B = 2 MiB / f32 block


def _round_up(n: int, m: int) -> int:
    return ((n + m - 1) // m) * m


def _dropout_prng_kernel(seed_ref, x_ref, o_ref, *, threshold: int, scale: float):
    """TPU path: per-tile hardware PRNG + integer threshold compare."""
    # Fold the grid position into the seed so every tile draws distinct bits.
    pltpu.prng_seed(seed_ref[0] + pl.program_id(0))
    bits = pltpu.bitcast(pltpu.prng_random_bits(x_ref.shape), jnp.int32)
    r = bits & jnp.int32(0x7FFFFFFF)                  # 31 uniform random bits
    keep = r >= jnp.int32(threshold)                  # P(keep) = 1 - p
    x = x_ref[...]
    scaled = x * jnp.asarray(scale, dtype=x.dtype)    # native-dtype mul (bf16 stays bf16)
    o_ref[...] = jnp.where(keep, scaled, jnp.zeros_like(scaled))


def _dropout_bits_kernel(x_ref, r_ref, o_ref, *, threshold: int, scale: float):
    """Portable fallback: random bits supplied as an input array."""
    keep = r_ref[...] >= jnp.int32(threshold)
    x = x_ref[...]
    scaled = x * jnp.asarray(scale, dtype=x.dtype)
    o_ref[...] = jnp.where(keep, scaled, jnp.zeros_like(scaled))


def fairseq_dropout(
    x: jax.Array,
    *,
    p: float,
    seed: int,
    training: bool = True,
    apply_during_inference: bool = False,
) -> jax.Array:
    """Pallas implementation of FairseqDropout.forward. x: (B, C, T)."""
    if not (p > 0.0 and (training or apply_during_inference)):
        # Identity path — matches `return x` in the PyTorch module.
        return x

    orig_shape = x.shape
    n = x.size
    threshold = max(0, min(int(float(p) * (1 << 31)), (1 << 31) - 1))
    scale = 1.0 / (1.0 - float(p))

    # Lane-dense 2-D slab: (rows_padded, _LANE), rows a multiple of the row tile.
    rows = -(-n // _LANE)
    block_rows = min(_BLOCK_ROWS, _round_up(rows, 8))
    rows_padded = _round_up(rows, block_rows)
    n_padded = rows_padded * _LANE

    x_flat = x.reshape(-1)
    if n_padded != n:
        x_flat = jnp.pad(x_flat, (0, n_padded - n))
    x2d = x_flat.reshape(rows_padded, _LANE)

    grid = (rows_padded // block_rows,)
    blk = (block_rows, _LANE)
    bytes_per_elem = jnp.dtype(x.dtype).itemsize

    if jax.default_backend() == "tpu":
        seed_arr = jnp.asarray([seed], dtype=jnp.int32)
        kernel = functools.partial(
            _dropout_prng_kernel, threshold=threshold, scale=scale
        )
        out2d = pl.pallas_call(
            kernel,
            out_shape=jax.ShapeDtypeStruct((rows_padded, _LANE), x.dtype),
            grid_spec=pltpu.PrefetchScalarGridSpec(
                num_scalar_prefetch=1,           # seed lives in SMEM
                grid=grid,
                in_specs=[pl.BlockSpec(blk, lambda i, _: (i, 0))],
                out_specs=pl.BlockSpec(blk, lambda i, _: (i, 0)),
            ),
            compiler_params=pltpu.CompilerParams(
                dimension_semantics=("parallel",),   # megacore split on v7x
                vmem_limit_bytes=64 * 1024 * 1024,
            ),
            cost_estimate=pl.CostEstimate(
                flops=2 * n_padded,
                transcendentals=0,
                bytes_accessed=2 * n_padded * bytes_per_elem,
            ),
        )(seed_arr, x2d)
    else:
        # Non-TPU backend (e.g. CPU interpreter): hardware PRNG unavailable,
        # so draw 31-bit randoms with jax.random and only threshold in-kernel.
        key = jax.random.PRNGKey(seed)
        bits = jax.random.bits(key, (rows_padded, _LANE), dtype=jnp.uint32)
        r = (bits >> 1).astype(jnp.int32)
        kernel = functools.partial(
            _dropout_bits_kernel, threshold=threshold, scale=scale
        )
        out2d = pl.pallas_call(
            kernel,
            out_shape=jax.ShapeDtypeStruct((rows_padded, _LANE), x.dtype),
            grid=grid,
            in_specs=[
                pl.BlockSpec(blk, lambda i: (i, 0)),
                pl.BlockSpec(blk, lambda i: (i, 0)),
            ],
            out_specs=pl.BlockSpec(blk, lambda i: (i, 0)),
        )(x2d, r)

    return out2d.reshape(-1)[:n].reshape(orig_shape)


if __name__ == "__main__":
    key = jax.random.PRNGKey(0)
    B, C, T = 2, 4, 16                      # (batch, channels, time) as in hifigan Conv1d
    x = jax.random.normal(key, (B, C, T), dtype=jnp.float32)

    p = 0.5

    # Training path: dropout applied inside the Pallas kernel.
    y_train = jax.block_until_ready(fairseq_dropout(x, p=p, seed=1234, training=True))

    # Eval path: identity (no kernel).
    y_eval = jax.block_until_ready(fairseq_dropout(x, p=p, seed=1234, training=False))

    assert y_train.shape == x.shape and y_train.dtype == x.dtype
    assert bool(jnp.all(y_eval == x))

    # Surviving elements are exactly x / (1 - p); dropped elements are 0.
    scale = 1.0 / (1.0 - p)
    kept = y_train != 0
    assert bool(
        jnp.all(jnp.where(kept, jnp.abs(y_train - x * scale), 0.0) < 1e-4)
    )

    print("KERNEL_OK")
</pallas_src>

<mosaic_0001>
module attributes {stable_mosaic.version = 11 : i64} {
  func.func @_dropout_bits_kernel(%arg0: i32, %arg1: memref<8x1024xf32, #tpu.memory_space<vmem>>, %arg2: memref<8x1024xi32, #tpu.memory_space<vmem>>, %arg3: memref<8x1024xf32, #tpu.memory_space<vmem>>) attributes {dimension_semantics = [#tpu.dimension_semantics<arbitrary>], iteration_bounds = array<i64: 1>, scalar_prefetch = 0 : i64, scratch_operands = 0 : i64, tpu.core_type = #tpu.core_type<tc>, window_params = [{transform_indices = @transform_0, window_bounds = array<i64: 8, 1024>}, {transform_indices = @transform_1, window_bounds = array<i64: 8, 1024>}, {transform_indices = @transform_2, window_bounds = array<i64: 8, 1024>}]} {
    %c0 = arith.constant 0 : index
    %c0_0 = arith.constant 0 : index
    %0 = vector.load %arg2[%c0, %c0_0] : memref<8x1024xi32, #tpu.memory_space<vmem>>, vector<8x1024xi32>
    %c1073741824_i32 = arith.constant 1073741824 : i32
    %1 = vector.broadcast %c1073741824_i32 : i32 to vector<8x1024xi32>
    %2 = arith.cmpi sge, %0, %1 : vector<8x1024xi32>
    %c0_1 = arith.constant 0 : index
    %c0_2 = arith.constant 0 : index
    %3 = vector.load %arg1[%c0_1, %c0_2] : memref<8x1024xf32, #tpu.memory_space<vmem>>, vector<8x1024xf32>
    %cst = arith.constant 2.000000e+00 : f32
    %4 = vector.broadcast %cst : f32 to vector<8x1024xf32>
    %5 = arith.mulf %3, %4 : vector<8x1024xf32>
    %cst_3 = arith.constant 0.000000e+00 : f32
    %6 = vector.broadcast %cst_3 : f32 to vector<8x1024xf32>
    %7 = arith.select %2, %5, %6 : vector<8x1024xi1>, vector<8x1024xf32>
    %c0_4 = arith.constant 0 : index
    %c0_5 = arith.constant 0 : index
    %8 = vector.load %arg3[%c0_4, %c0_5] : memref<8x1024xf32, #tpu.memory_space<vmem>>, vector<8x1024xf32>
    tpu.vector_store %arg3[%c0_4, %c0_5], %7 {strides = array<i32>} : memref<8x1024xf32, #tpu.memory_space<vmem>>, vector<8x1024xf32>,
    return
  }
  func.func @transform_0(%arg0: i32) -> (i32, i32) {
    %c0_i32 = arith.constant 0 : i32
    %c0_i32_0 = arith.constant 0 : i32
    return %arg0, %c0_i32 : i32, i32
  }
  func.func @transform_1(%arg0: i32) -> (i32, i32) {
    %c0_i32 = arith.constant 0 : i32
    %c0_i32_0 = arith.constant 0 : i32
    return %arg0, %c0_i32 : i32, i32
  }
  func.func @transform_2(%arg0: i32) -> (i32, i32) {
    %c0_i32 = arith.constant 0 : i32
    %c0_i32_0 = arith.constant 0 : i32
    return %arg0, %c0_i32 : i32, i32
  }
}

</mosaic_0001>

<bundles_post_ra>
// kernel: tpu_custom_call.1
= control target key start
LH: loop header
LB: loop body
LE: loop exit
PB: predicated region body
PF: predicated region fallthrough
CT: control target
= control target key end

     0   :  { %7 = vsyncpa [#allocation3], 0  ;;  %s235_s0 = inlined_call_operand.hbm [shape: f32[8,1024], index: 0, kind: input, shape index: {}]   ;;  %s236_s1 = inlined_call_operand.hbm [shape: s32[8,1024], index: 1, kind: input, shape index: {}]   ;;  %s237_s2 = inlined_call_operand.hbm [shape: f32[8,1024], index: 2, kind: output, shape index: {}]  }
   0x1   :  { %8 = vsyncpa [#allocation6], 0 }
   0x2   :  { %9 = vsyncpa [#allocation4], 0  ;;  %s175_s9 = smov [#allocation2]   ;;  %s176_s11 = smov [#allocation5]  }
   0x3   :  { %s16_s10 = sshll.u32 %s175_s9, 4  ;;  %s26_s12 = sshll.u32 %s176_s11, 4  ;;  %s17_s10 = int_to_ptr.vmem [resolvable:$true] %s16_s10  ;;  %s27_s12 = int_to_ptr.vmem [resolvable:$true] %s26_s12 }
   0x4   :  { %s103_s15 = scalar_lea.hbm %s235_s0, 1024 }
   0x5   :  { %p104_p0 = scmp.ne.s32.totalorder %s235_s0, %s103_s15  ;;  %p107_p1 = scmp.lt.u32.totalorder %s103_s15, %s235_s0 }
   0x7   :  { %p109_p2 = pnand %p107_p1, %p104_p0 }
   0x9   :  { %112 = shalt.err (!%p109_p2)
}
   0xa   :  { %s113_s20 = scalar_lea.vmem %s17_s10, 1024  ;;  %p118_p4 = scmp.lt.s32.totalorder %s17_s10, %s17_s10 }
   0xb   :  { %p114_p3 = scmp.ne.s32.totalorder %s17_s10, %s113_s20  ;;  %p119_p5 = scmp.lt.s32.totalorder %s113_s20, %s113_s20 }
   0xd   :  { %p120_p6 = por %p119_p5, %p118_p4 }
   0xf   :  { %p121_p7 = pnand %p120_p6, %p114_p3 }
  0x11   :  { %124 = shalt.err (!%p121_p7)
}
  0x12   :  { %19 = dma.hbm_to_vmem [thread:$0]  %s235_s0, 1024, %s17_s10, [#allocation3]  }
  0x13   :  { %s125_s25 = scalar_lea.hbm %s236_s1, 1024 }
  0x14   :  { %p126_p8 = scmp.ne.s32.totalorder %s236_s1, %s125_s25  ;;  %p129_p9 = scmp.lt.u32.totalorder %s125_s25, %s236_s1 }
  0x16   :  { %p131_p10 = pnand %p129_p9, %p126_p8 }
  0x18   :  { %134 = shalt.err (!%p131_p10)
}
  0x19   :  { %s135_s30 = scalar_lea.vmem %s27_s12, 1024  ;;  %p140_p12 = scmp.lt.s32.totalorder %s27_s12, %s27_s12 }
  0x1a   :  { %p136_p11 = scmp.ne.s32.totalorder %s27_s12, %s135_s30  ;;  %p141_p13 = scmp.lt.s32.totalorder %s135_s30, %s135_s30 }
  0x1c   :  { %p142_p0 = por %p141_p13, %p140_p12 }
  0x1e   :  { %p143_p1 = pnand %p142_p0, %p136_p11 }
  0x20   :  { %146 = shalt.err (!%p143_p1)
}
  0x21   :  { %29 = dma.hbm_to_vmem [thread:$0]  %s236_s1, 1024, %s27_s12, [#allocation6]  }
  0x22   :  { %169 = dma.done.wait [#allocation3], 1024  }
  0x23   :  { %170 = vsyncadd [#allocation3], 4294966272 }
  0x24   :  { %171 = dma.done.wait [#allocation6], 1024  }
  0x25   :  { %172 = vsyncadd [#allocation6], 4294966272  ;;  %v36_v0 = vld [vmem:[#allocation5] sm:$0xff]  ;;  %v37_v2 = vld [vmem:[#allocation5 + $0x8] sm:$0xff]  ;;  %s177_s4 = smov [#allocation7]  }
  0x26   :  { %v52_v1 = vld [vmem:[#allocation2] sm:$0xff]  ;;  %s217_s5 = sshll.u32 %s177_s4, 4  ;;  %vm44_vm0 = vcmp.ge.s32.totalorder %v36_v0, 1073741824  ;;  %vm45_vm1 = vcmp.ge.s32.totalorder %v37_v2, 1073741824  ;;  %v53_v4 = vld [vmem:[#allocation2 + $0x8] sm:$0xff]  ;;  %v38_v5 = vld [vmem:[#allocation5 + $0x10] sm:$0xff]  ;;  %s91_s5 = int_to_ptr.vmem [resolvable:$true] %s217_s5 }
  0x27   :  { %v60_v3 = vmul.f32 2.0, %v52_v1  ;;  %v54_v6 = vld [vmem:[#allocation2 + $0x10] sm:$0xff]  ;;  %v61_v7 = vmul.f32 2.0, %v53_v4  ;;  %vm46_vm2 = vcmp.ge.s32.totalorder %v38_v5, 1073741824  ;;  %v39_v9 = vld [vmem:[#allocation5 + $0x18] sm:$0xff]  ;;  %v40_v11 = vld [vmem:[#allocation5 + $0x20] sm:$0xff]  ;;  %p152_p3 = scmp.lt.s32.totalorder %s91_s5, %s91_s5 }
  0x28   :  { %v62_v8 = vmul.f32 2.0, %v54_v6  ;;  %v55_v10 = vld [vmem:[#allocation2 + $0x18] sm:$0xff]  ;;  %vm47_vm3 = vcmp.ge.s32.totalorder %v39_v9, 1073741824  ;;  %vm48_vm4 = vcmp.ge.s32.totalorder %v40_v11, 1073741824  ;;  %v56_v14 = vld [vmem:[#allocation2 + $0x20] sm:$0xff]  ;;  %v41_v15 = vld [vmem:[#allocation5 + $0x28] sm:$0xff] }
  0x29   :  { %v68_v12 = vsel %vm44_vm0, %v60_v3, 0.0  ;;  %v63_v13 = vmul.f32 2.0, %v55_v10  ;;  %v69_v16 = vsel %vm45_vm1, %v61_v7, 0.0  ;;  %v64_v18 = vmul.f32 2.0, %v56_v14  ;;  %v57_v19 = vld [vmem:[#allocation2 + $0x28] sm:$0xff]  ;;  %v42_v20 = vld [vmem:[#allocation5 + $0x30] sm:$0xff] }
  0x2a   :  { %76 = vst [vmem:[#allocation7] sm:$0xff] %v68_v12  ;;  %v70_v17 = vsel %vm46_vm2, %v62_v8, 0.0  ;;  %vm49_vm5 = vcmp.ge.s32.totalorder %v41_v15, 1073741824  ;;  %77 = vst [vmem:[#allocation7 + $0x8] sm:$0xff] %v69_v16  ;;  %v65_v22 = vmul.f32 2.0, %v57_v19  ;;  %vm50_vm6 = vcmp.ge.s32.totalorder %v42_v20, 1073741824 }
  0x2b   :  { %78 = vst [vmem:[#allocation7 + $0x10] sm:$0xff] %v70_v17  ;;  %v71_v21 = vsel %vm47_vm3, %v63_v13, 0.0  ;;  %v58_v23 = vld [vmem:[#allocation2 + $0x30] sm:$0xff]  ;;  %v43_v24 = vld [vmem:[#allocation5 + $0x38] sm:$0xff]  ;;  %v72_v26 = vsel %vm48_vm4, %v64_v18, 0.0  ;;  %s147_s1 = scalar_lea.vmem %s91_s5, 1024 }
  0x2c   :  { %v59_v25 = vld [vmem:[#allocation2 + $0x38] sm:$0xff]  ;;  %79 = vst [vmem:[#allocation7 + $0x18] sm:$0xff] %v71_v21  ;;  %v66_v27 = vmul.f32 2.0, %v58_v23  ;;  %vm51_vm7 = vcmp.ge.s32.totalorder %v43_v24, 1073741824  ;;  %80 = vst [vmem:[#allocation7 + $0x20] sm:$0xff] %v72_v26  ;;  %v73_v29 = vsel %vm49_vm5, %v65_v22, 0.0  ;;  %p148_p2 = scmp.ne.s32.totalorder %s91_s5, %s147_s1  ;;  %p153_p4 = scmp.lt.s32.totalorder %s147_s1, %s147_s1 }
  0x2d   :  { %v67_v28 = vmul.f32 2.0, %v59_v25  ;;  %81 = vst [vmem:[#allocation7 + $0x28] sm:$0xff] %v73_v29 }
  0x2e   :  { %v74_v30 = vsel %vm50_vm6, %v66_v27, 0.0  ;;  %p154_p5 = por %p153_p4, %p152_p3 }
  0x2f   :  { %v75_v31 = vsel %vm51_vm7, %v67_v28, 0.0  ;;  %82 = vst [vmem:[#allocation7 + $0x30] sm:$0xff] %v74_v30 }
  0x30   :  { %83 = vst [vmem:[#allocation7 + $0x38] sm:$0xff] %v75_v31  ;;  %p155_p6 = pnand %p154_p5, %p148_p2 }
  0x32   :  { %158 = shalt.err (!%p155_p6)
}
  0x33   :  { %s159_s8 = scalar_lea.hbm %s237_s2, 1024 }
  0x34   :  { %p160_p7 = scmp.ne.s32.totalorder %s237_s2, %s159_s8  ;;  %p163_p8 = scmp.lt.u32.totalorder %s159_s8, %s237_s2 }
  0x36   :  { %p165_p9 = pnand %p163_p8, %p160_p7 }
  0x38   :  { %168 = shalt.err (!%p165_p9)
}
  0x39   :  { %93 = dma.vmem_to_hbm [thread:$0]  %s91_s5, 1024, %s237_s2, [#allocation4]  }
  0x3a   :  { %173 = dma.done.wait [#allocation4], 1024  }
  0x3b   :  { %174 = vsyncadd [#allocation4], 4294966272 }
  0x3c   :  { %97 = vsyncpa [#allocation3], 1 }
  0x3d   :  { %98 = vsyncpa [#allocation6], 1 }
  0x3e   :  { %99 = vsyncpa [#allocation4], 1 }

</bundles_post_ra>
